<compile_context>
chip_gen: v7x
topology: tpu7x:2x2x1
jax: 0.10.0
libtpu: 0.0.40
codegen_flags: <defaults>
</compile_context>

<pallas_src>
from functools import partial

import jax
import jax.numpy as jnp
from jax.experimental import pallas as pl
from jax.experimental.pallas import tpu as pltpu


def _leaky_relu(x, slope=0.01):
    return jnp.where(x >= 0, x, slope * x)


def _round_up(n, m):
    return ((n + m - 1) // m) * m


# ---------------------------------------------------------------------------
# Kernel: 4 matmuls on a packed (tb, SLAB) activation slab.
# ---------------------------------------------------------------------------
def _resnet2_kernel(x_ref, w1c_ref, row1_ref, w2_ref, w3_ref, w4_ref, out_ref,
                    *, F, H, cdt):
    x = x_ref[...]                                                  # (TB, F) f32

    # Block 1 + identity embed of x, single K=F matmul.
    #   w1c cols [0,F)  = I_F            -> slab carries x
    #   w1c cols [F,F+H)= bn1-folded W1  -> x @ W1
    #   row1 adds b1 under the x1 cols and 1.0 at the bias column.
    t = jnp.dot(x.astype(cdt), w1c_ref[...],
                preferred_element_type=jnp.float32) + row1_ref[...]
    lane = jax.lax.broadcasted_iota(jnp.int32, t.shape, 1)
    x1_cols = jnp.logical_and(lane >= F, lane < F + H)
    slab = jnp.where(x1_cols, _leaky_relu(t), t)                    # [x|x1|0|0|1]

    # Block 2: cat([x, x1]) @ W2 + b2.  y is exactly zero outside the x2 cols,
    # and leaky_relu(0)=0, so the residual add cannot corrupt other columns.
    y = jnp.dot(slab.astype(cdt), w2_ref[...], preferred_element_type=jnp.float32)
    slab = slab + _leaky_relu(y)                                    # [x|x1|x2|0|1]

    # Block 3: cat([x1, x2]) @ W3 + b3   (NO activation in resnetModel2).
    y = jnp.dot(slab.astype(cdt), w3_ref[...], preferred_element_type=jnp.float32)
    slab = slab + y                                                 # [x|x1|x2|x3|1]

    # Head: cat([x2, x3]) @ W4 + b4  -> (TB, T), lane width = real num_targets.
    out = jnp.dot(slab.astype(cdt), w4_ref[...], preferred_element_type=jnp.float32)
    out_ref[...] = out.astype(out_ref.dtype)


# ---------------------------------------------------------------------------
# Wrapper
# ---------------------------------------------------------------------------
def resnet2_forward(x, p, *, tb=1024, use_bf16=True):
    """x: (B, F) float32.  p: packed params from fold_params()."""
    B, F = x.shape
    assert F == p["F"], "feature dim mismatch vs folded params"
    H, T = p["H"], p["T"]

    # --- batch tiling: big tiles amortize per-step overhead, multiples of 8,
    # and split into >=2 grid steps when possible so the "parallel" batch axis
    # shards across both v7x TensorCores (no-op on single-TC v5e/v6e).
    tb = _round_up(max(tb, 8), 8)
    tb = min(tb, _round_up(B, 8))
    if B >= 16 and _round_up(B, tb) // tb < 2:
        tb = _round_up(pl.cdiv(B, 2), 8)
    Bp = _round_up(B, tb)
    if Bp != B:
        x = jnp.pad(x, ((0, Bp - B), (0, 0)))

    # Weights go to bf16 for native MXU rate (f32 accumulate); the bias/ones row
    # stays f32 since it lives on the VPU add path.
    wdt = jnp.bfloat16 if use_bf16 else jnp.float32
    w1c = p["w1c"].astype(wdt)
    w2 = p["w2"].astype(wdt)
    w3 = p["w3"].astype(wdt)
    w4 = p["w4"].astype(wdt)
    row1 = p["row1"]

    def wfull(arr):
        # Whole-array, grid-invariant block (constant index map -> fetched once).
        # TODO(synk): pipeline_mode=pl.Buffered(1) would also drop the unused
        # second buffer for these invariant operands; left at default buffering
        # to keep lowering maximally portable.
        return pl.BlockSpec(arr.shape, lambda i: (0, 0))

    kernel = partial(_resnet2_kernel, F=F, H=H, cdt=wdt)

    out = pl.pallas_call(
        kernel,
        out_shape=jax.ShapeDtypeStruct((Bp, T), jnp.float32),
        grid=(Bp // tb,),
        in_specs=[
            pl.BlockSpec((tb, F), lambda i: (i, 0)),   # x, tiled over batch
            wfull(w1c), wfull(row1), wfull(w2), wfull(w3), wfull(w4),
        ],
        out_specs=pl.BlockSpec((tb, T), lambda i: (i, 0)),
        compiler_params=pltpu.CompilerParams(
            dimension_semantics=("parallel",),
        ),
    )(x, w1c, row1, w2, w3, w4)
    return out[:B]


# ---------------------------------------------------------------------------
# Parameter construction (deterministic, in-script) + BN folding + slab packing
# ---------------------------------------------------------------------------
def _weight_norm_linear(key, in_dim, out_dim):
    """PyTorch nn.utils.weight_norm(nn.Linear): W = g * v / ||v||_row (dim=0)."""
    kv, kg, kb = jax.random.split(key, 3)
    v = jax.random.normal(kv, (out_dim, in_dim), jnp.float32) * 0.1
    g = 1.0 + 0.1 * jax.random.normal(kg, (out_dim, 1), jnp.float32)
    b = 0.1 * jax.random.normal(kb, (out_dim,), jnp.float32)
    w = g * v / (jnp.linalg.norm(v, axis=1, keepdims=True) + 1e-12)   # (out, in)
    return w.T, b.reshape(1, out_dim)                                 # (in,out),(1,out)


def _batchnorm_eval(key, dim, eps=1e-5):
    """Eval-mode BatchNorm1d as per-feature scale/shift."""
    kg, kb, km, kv = jax.random.split(key, 4)
    gamma = 1.0 + 0.1 * jax.random.normal(kg, (dim,), jnp.float32)
    beta = 0.1 * jax.random.normal(kb, (dim,), jnp.float32)
    run_mean = 0.1 * jax.random.normal(km, (dim,), jnp.float32)
    run_var = 1.0 + 0.1 * jax.random.uniform(kv, (dim,), jnp.float32)
    scale = gamma / jnp.sqrt(run_var + eps)
    shift = beta - run_mean * scale
    return scale.reshape(1, dim), shift.reshape(1, dim)


def make_raw_params(key, num_features, num_targets, hidden_size):
    keys = jax.random.split(key, 8)
    F, H = num_features, hidden_size
    p = {}
    p["bn1_s"], p["bn1_b"] = _batchnorm_eval(keys[0], F)
    p["w1"], p["b1"] = _weight_norm_linear(keys[1], F, H)
    p["bn2_s"], p["bn2_b"] = _batchnorm_eval(keys[2], F + H)
    p["w2"], p["b2"] = _weight_norm_linear(keys[3], F + H, H)
    p["bn3_s"], p["bn3_b"] = _batchnorm_eval(keys[4], 2 * H)
    p["w3"], p["b3"] = _weight_norm_linear(keys[5], 2 * H, H)
    p["bn4_s"], p["bn4_b"] = _batchnorm_eval(keys[6], 2 * H)
    p["w4"], p["b4"] = _weight_norm_linear(keys[7], 2 * H, num_targets)
    return p


def fold_params(raw, lane=128):
    """Fold eval BN into the linears and pack them for the slab kernel.

    Slab column layout (width SLAB = round_up(F + 3H + 1, 128)):
        [0, F)           : x
        [F, F+H)         : x1
        [F+H, F+2H)      : x2
        [F+2H, F+3H)     : x3
        F+3H             : constant 1.0 (carries biases as weight rows)
        rest             : zero
    """
    F = raw["w1"].shape[0]
    H = raw["w1"].shape[1]
    T = raw["w4"].shape[1]
    slab = max(lane, _round_up(F + 3 * H + 1, lane))
    bias_col = F + 3 * H

    def fold(scale, shift, w, b):
        wf = scale.reshape(-1, 1) * w                # diag(scale) @ W
        bf = shift.reshape(1, -1) @ w + b            # shift @ W + b
        return wf, bf

    w1f, b1f = fold(raw["bn1_s"], raw["bn1_b"], raw["w1"], raw["b1"])   # (F,H)
    w2f, b2f = fold(raw["bn2_s"], raw["bn2_b"], raw["w2"], raw["b2"])   # (F+H,H)
    w3f, b3f = fold(raw["bn3_s"], raw["bn3_b"], raw["w3"], raw["b3"])   # (2H,H)
    w4f, b4f = fold(raw["bn4_s"], raw["bn4_b"], raw["w4"], raw["b4"])   # (2H,T)

    # Block 1 combo: identity-embed x into cols [0,F) and W1 into cols [F,F+H).
    w1c = jnp.zeros((F, slab), jnp.float32)
    w1c = w1c.at[:, :F].set(jnp.eye(F, dtype=jnp.float32))
    w1c = w1c.at[:, F:F + H].set(w1f)

    # Constant row added after block 1: b1 under the x1 cols + the ones column.
    row1 = jnp.zeros((1, slab), jnp.float32)
    row1 = row1.at[:, F:F + H].set(b1f)
    row1 = row1.at[:, bias_col].set(1.0)

    # Block 2: reads cols [0, F+H) (= cat([x, x1])), writes cols [F+H, F+2H).
    w2p = jnp.zeros((slab, slab), jnp.float32)
    w2p = w2p.at[:F + H, F + H:F + 2 * H].set(w2f)
    w2p = w2p.at[bias_col, F + H:F + 2 * H].set(b2f[0])

    # Block 3: reads cols [F, F+2H) (= cat([x1, x2])), writes cols [F+2H, F+3H).
    w3p = jnp.zeros((slab, slab), jnp.float32)
    w3p = w3p.at[F:F + 2 * H, F + 2 * H:F + 3 * H].set(w3f)
    w3p = w3p.at[bias_col, F + 2 * H:F + 3 * H].set(b3f[0])

    # Head: reads cols [F+H, F+3H) (= cat([x2, x3])), outputs the real T cols.
    w4p = jnp.zeros((slab, T), jnp.float32)
    w4p = w4p.at[F + H:F + 3 * H, :].set(w4f)
    w4p = w4p.at[bias_col, :].set(b4f[0])

    return {"w1c": w1c, "row1": row1, "w2": w2p, "w3": w3p, "w4": w4p,
            "F": F, "H": H, "T": T, "slab": slab}


# ---------------------------------------------------------------------------
# Pure-JAX reference of resnetModel2.forward (eval mode), using RAW params
# ---------------------------------------------------------------------------
def resnet2_reference(x, r):
    P = jax.lax.Precision.HIGHEST
    x1 = x * r["bn1_s"] + r["bn1_b"]
    x1 = _leaky_relu(jnp.dot(x1, r["w1"], precision=P) + r["b1"])
    xc = jnp.concatenate([x, x1], axis=1)
    x2 = xc * r["bn2_s"] + r["bn2_b"]
    x2 = _leaky_relu(jnp.dot(x2, r["w2"], precision=P) + r["b2"])
    xc2 = jnp.concatenate([x1, x2], axis=1)
    x3 = xc2 * r["bn3_s"] + r["bn3_b"]
    x3 = jnp.dot(x3, r["w3"], precision=P) + r["b3"]
    xc3 = jnp.concatenate([x2, x3], axis=1)
    x4 = xc3 * r["bn4_s"] + r["bn4_b"]
    return jnp.dot(x4, r["w4"], precision=P) + r["b4"]


if __name__ == "__main__":
    num_features, num_targets, hidden_size = 16, 8, 32
    batch = 200        # ragged: exercises batch padding and the 2-step grid split

    key = jax.random.PRNGKey(0)
    kx, kp = jax.random.split(key)
    x = jax.random.normal(kx, (batch, num_features), jnp.float32)

    raw = make_raw_params(kp, num_features, num_targets, hidden_size)
    packed = fold_params(raw)
    ref = resnet2_reference(x, raw)

    # f32 accuracy mode (tight check against the HIGHEST-precision reference).
    out_f32 = jax.block_until_ready(resnet2_forward(x, packed, tb=1024, use_bf16=False))
    assert out_f32.shape == (batch, num_targets)
    assert jnp.allclose(out_f32, ref, atol=5e-4, rtol=5e-4), "f32 mismatch vs reference"

    # bf16 fast mode (native MXU rate) — looser tolerance, f32 accumulation.
    out_bf16 = jax.block_until_ready(resnet2_forward(x, packed, tb=1024, use_bf16=True))
    assert out_bf16.shape == (batch, num_targets)
    assert jnp.allclose(out_bf16, ref, atol=5e-2, rtol=5e-2), "bf16 mismatch vs reference"

    print("KERNEL_OK")
</pallas_src>

<mosaic_0001>
module attributes {stable_mosaic.version = 11 : i64} {
  func.func @_resnet2_kernel(%arg0: i32, %arg1: memref<104x16xf32, #tpu.memory_space<vmem>>, %arg2: memref<16x128xf32, #tpu.memory_space<vmem>>, %arg3: memref<1x128xf32, #tpu.memory_space<vmem>>, %arg4: memref<128x128xf32, #tpu.memory_space<vmem>>, %arg5: memref<128x128xf32, #tpu.memory_space<vmem>>, %arg6: memref<128x8xf32, #tpu.memory_space<vmem>>, %arg7: memref<104x8xf32, #tpu.memory_space<vmem>>) attributes {dimension_semantics = [#tpu.dimension_semantics<parallel>], iteration_bounds = array<i64: 2>, scalar_prefetch = 0 : i64, scratch_operands = 0 : i64, tpu.core_type = #tpu.core_type<tc>, window_params = [{transform_indices = @transform_0, window_bounds = array<i64: 104, 16>}, {pipeline_mode = #tpu.pipeline_mode<synchronous>, transform_indices = @transform_1, window_bounds = array<i64: 16, 128>}, {pipeline_mode = #tpu.pipeline_mode<synchronous>, transform_indices = @transform_2, window_bounds = array<i64: 1, 128>}, {pipeline_mode = #tpu.pipeline_mode<synchronous>, transform_indices = @transform_3, window_bounds = array<i64: 128, 128>}, {pipeline_mode = #tpu.pipeline_mode<synchronous>, transform_indices = @transform_4, window_bounds = array<i64: 128, 128>}, {pipeline_mode = #tpu.pipeline_mode<synchronous>, transform_indices = @transform_5, window_bounds = array<i64: 128, 8>}, {transform_indices = @transform_6, window_bounds = array<i64: 104, 8>}]} {
    %c0 = arith.constant 0 : index
    %c0_0 = arith.constant 0 : index
    %0 = vector.load %arg1[%c0, %c0_0] : memref<104x16xf32, #tpu.memory_space<vmem>>, vector<104x16xf32>
    %c0_1 = arith.constant 0 : index
    %c0_2 = arith.constant 0 : index
    %1 = vector.load %arg2[%c0_1, %c0_2] : memref<16x128xf32, #tpu.memory_space<vmem>>, vector<16x128xf32>
    %cst = arith.constant dense<0.000000e+00> : vector<104x128xf32>
    %2 = tpu.matmul %0, %1, %cst {dimension_numbers = #tpu.dot_dimension_numbers<[1], [0], [0], [1], [0, 0, 1, 1], [], []>} : vector<104x16xf32>, vector<16x128xf32>, vector<104x128xf32> -> vector<104x128xf32>
    %c0_3 = arith.constant 0 : index
    %c0_4 = arith.constant 0 : index
    %3 = vector.load %arg3[%c0_3, %c0_4] : memref<1x128xf32, #tpu.memory_space<vmem>>, vector<1x128xf32>
    %4 = vector.broadcast %3 : vector<1x128xf32> to vector<104x128xf32>
    %5 = arith.addf %2, %4 : vector<104x128xf32>
    %6 = tpu.iota {dimensions = array<i32: 1>} : vector<104x128xi32>
    %c16_i32 = arith.constant 16 : i32
    %7 = vector.broadcast %c16_i32 : i32 to vector<104x128xi32>
    %8 = arith.cmpi sge, %6, %7 : vector<104x128xi32>
    %c48_i32 = arith.constant 48 : i32
    %9 = vector.broadcast %c48_i32 : i32 to vector<104x128xi32>
    %10 = arith.cmpi slt, %6, %9 : vector<104x128xi32>
    %11 = arith.andi %8, %10 : vector<104x128xi1>
    %cst_5 = arith.constant 0.000000e+00 : f32
    %12 = vector.broadcast %cst_5 : f32 to vector<104x128xf32>
    %13 = arith.cmpf oge, %5, %12 : vector<104x128xf32>
    %cst_6 = arith.constant 0.00999999977 : f32
    %14 = vector.broadcast %cst_6 : f32 to vector<104x128xf32>
    %15 = arith.mulf %14, %5 : vector<104x128xf32>
    %16 = arith.select %13, %5, %15 : vector<104x128xi1>, vector<104x128xf32>
    %17 = arith.select %11, %16, %5 : vector<104x128xi1>, vector<104x128xf32>
    %c0_7 = arith.constant 0 : index
    %c0_8 = arith.constant 0 : index
    %18 = vector.load %arg4[%c0_7, %c0_8] : memref<128x128xf32, #tpu.memory_space<vmem>>, vector<128x128xf32>
    %cst_9 = arith.constant dense<0.000000e+00> : vector<104x128xf32>
    %19 = tpu.matmul %17, %18, %cst_9 {dimension_numbers = #tpu.dot_dimension_numbers<[1], [0], [0], [1], [0, 0, 1, 1], [], []>} : vector<104x128xf32>, vector<128x128xf32>, vector<104x128xf32> -> vector<104x128xf32>
    %cst_10 = arith.constant 0.000000e+00 : f32
    %20 = vector.broadcast %cst_10 : f32 to vector<104x128xf32>
    %21 = arith.cmpf oge, %19, %20 : vector<104x128xf32>
    %cst_11 = arith.constant 0.00999999977 : f32
    %22 = vector.broadcast %cst_11 : f32 to vector<104x128xf32>
    %23 = arith.mulf %22, %19 : vector<104x128xf32>
    %24 = arith.select %21, %19, %23 : vector<104x128xi1>, vector<104x128xf32>
    %25 = arith.addf %17, %24 : vector<104x128xf32>
    %c0_12 = arith.constant 0 : index
    %c0_13 = arith.constant 0 : index
    %26 = vector.load %arg5[%c0_12, %c0_13] : memref<128x128xf32, #tpu.memory_space<vmem>>, vector<128x128xf32>
    %cst_14 = arith.constant dense<0.000000e+00> : vector<104x128xf32>
    %27 = tpu.matmul %25, %26, %cst_14 {dimension_numbers = #tpu.dot_dimension_numbers<[1], [0], [0], [1], [0, 0, 1, 1], [], []>} : vector<104x128xf32>, vector<128x128xf32>, vector<104x128xf32> -> vector<104x128xf32>
    %28 = arith.addf %25, %27 : vector<104x128xf32>
    %c0_15 = arith.constant 0 : index
    %c0_16 = arith.constant 0 : index
    %29 = vector.load %arg6[%c0_15, %c0_16] : memref<128x8xf32, #tpu.memory_space<vmem>>, vector<128x8xf32>
    %cst_17 = arith.constant dense<0.000000e+00> : vector<104x8xf32>
    %30 = tpu.matmul %28, %29, %cst_17 {dimension_numbers = #tpu.dot_dimension_numbers<[1], [0], [0], [1], [0, 0, 1, 1], [], []>} : vector<104x128xf32>, vector<128x8xf32>, vector<104x8xf32> -> vector<104x8xf32>
    %c0_18 = arith.constant 0 : index
    %c0_19 = arith.constant 0 : index
    %31 = vector.load %arg7[%c0_18, %c0_19] : memref<104x8xf32, #tpu.memory_space<vmem>>, vector<104x8xf32>
    tpu.vector_store %arg7[%c0_18, %c0_19], %30 {strides = array<i32>} : memref<104x8xf32, #tpu.memory_space<vmem>>, vector<104x8xf32>,
    return
  }
  func.func @transform_0(%arg0: i32) -> (i32, i32) {
    %c0_i32 = arith.constant 0 : i32
    %c0_i32_0 = arith.constant 0 : i32
    return %arg0, %c0_i32 : i32, i32
  }
  func.func @transform_1(%arg0: i32) -> (i32, i32) {
    %c0_i32 = arith.constant 0 : i32
    %c0_i32_0 = arith.constant 0 : i32
    %c0_i32_1 = arith.constant 0 : i32
    return %c0_i32, %c0_i32_0 : i32, i32
  }
  func.func @transform_2(%arg0: i32) -> (i32, i32) {
    %c0_i32 = arith.constant 0 : i32
    %c0_i32_0 = arith.constant 0 : i32
    %c0_i32_1 = arith.constant 0 : i32
    return %c0_i32, %c0_i32_0 : i32, i32
  }
  func.func @transform_3(%arg0: i32) -> (i32, i32) {
    %c0_i32 = arith.constant 0 : i32
    %c0_i32_0 = arith.constant 0 : i32
    %c0_i32_1 = arith.constant 0 : i32
    return %c0_i32, %c0_i32_0 : i32, i32
  }
  func.func @transform_4(%arg0: i32) -> (i32, i32) {
    %c0_i32 = arith.constant 0 : i32
    %c0_i32_0 = arith.constant 0 : i32
    %c0_i32_1 = arith.constant 0 : i32
    return %c0_i32, %c0_i32_0 : i32, i32
  }
  func.func @transform_5(%arg0: i32) -> (i32, i32) {
    %c0_i32 = arith.constant 0 : i32
    %c0_i32_0 = arith.constant 0 : i32
    %c0_i32_1 = arith.constant 0 : i32
    return %c0_i32, %c0_i32_0 : i32, i32
  }
  func.func @transform_6(%arg0: i32) -> (i32, i32) {
    %c0_i32 = arith.constant 0 : i32
    %c0_i32_0 = arith.constant 0 : i32
    return %arg0, %c0_i32 : i32, i32
  }
}

</mosaic_0001>

<bundles_post_ra>
// kernel: tpu_custom_call.1
= control target key start
LH: loop header
LB: loop body
LE: loop exit
PB: predicated region body
PF: predicated region fallthrough
CT: control target
= control target key end

     0   :  { %s1606_s21 = smov 0   ;;  %s2137_s0 = inlined_call_operand.vmem [shape: f32[208,16], index: 0, kind: input, shape index: {}]   ;;  %s2138_s1 = inlined_call_operand.vmem [shape: f32[16,128], index: 1, kind: input, shape index: {}]   ;;  %s2139_s2 = inlined_call_operand.vmem [shape: f32[1,128], index: 2, kind: input, shape index: {}]   ;;  %s2140_s3 = inlined_call_operand.vmem [shape: f32[128,128], index: 3, kind: input, shape index: {}]   ;;  %s2141_s4 = inlined_call_operand.vmem [shape: f32[128,128], index: 4, kind: input, shape index: {}]   ;;  %s2142_s5 = inlined_call_operand.vmem [shape: f32[128,8], index: 5, kind: input, shape index: {}]   ;;  %s2143_s6 = inlined_call_operand.vmem [shape: f32[208,8], index: 6, kind: output, shape index: {}]  }
   0x1 LB: > { %s1077_s22 = sadd.s32 4294967295, %s1566_s21   ;;  %p1081_p0 = scmp.ge.s32.totalorder %s1566_s21, 1  ;;  %s1566_s21 = sphi %s1606_s21, %s16_s21  }
   0x2   : > { %p213_p1 = scmp.lt.s32.totalorder %s1566_s21, 3 }
   0x4   : > { %p214_p2 = pnand %p1081_p0, %p213_p1 }
   0x5   : > { %v268_v0 = vld [vmem:[%s2138_s1] sm:$0xff] (!%p214_p2)  ;;  %v269_v1 = vld [vmem:[%s2138_s1 + $0x8] sm:$0xff] (!%p214_p2)  ;;  %s243_s27 = smul.u32 (!%p214_p2), 13, %s1077_s22  ;;  %v1568_v2 = vmov (!%p214_p2), 0.0|0.0   ;;  %vm1569_vm0 = vmmov (!%p214_p2), 0   ;;  %v1570_v4 = vmov (!%p214_p2), 0.0   ;;  %v447_v63 = vlaneseq (!%p214_p2) }
   0x6   : > { %217 = sbr.rel (%p214_p2) target bundleno = 927 (0x39f), region = 44  ;;  %1458 = vmatprep.subr.bf16.mxu0 (!%p214_p2), %v1568_v2  ;;  %v1459_v3 = vpack.c.bf16 (!%p214_p2), %v269_v1, %v268_v0  ;;  %1206 = vmatprep.mubr.msk.f32.mxu0 (!%p214_p2), %vm1569_vm0, %v1570_v4  ;;  %v504_v5 = vld [vmem:[%s2140_s3] sm:$0xff] (!%p214_p2)  ;;  %v505_v6 = vld [vmem:[%s2140_s3 + $0x8] sm:$0xff] (!%p214_p2)  ;;  %v506_v7 = vld [vmem:[%s2140_s3 + $0x10] sm:$0xff] (!%p214_p2)  ;;  %vm277_vm1 = vcmask (!%p214_p2), 130048  }
   0x7   : > { %p244_p3 = scmp.lt.s32.totalorder (!%p214_p2), %s243_s27, 25  ;;  %1461 = vmatprep.subr.bf16.mxu1 (!%p214_p2), %v1568_v2  ;;  %v1462_v8 = vpack.c.bf16 (!%p214_p2), %v505_v6, %v504_v5  ;;  %v507_v9 = vld [vmem:[%s2140_s3 + $0x18] sm:$0xff] (!%p214_p2)  ;;  %1277 = vmatprep.mubr.msk.f32.mxu1 (!%p214_p2), %vm1569_vm0, %v1570_v4  ;;  %v508_v11 = vld [vmem:[%s2140_s3 + $0x20] sm:$0xff] (!%p214_p2)  ;;  %v509_v12 = vld [vmem:[%s2140_s3 + $0x28] sm:$0xff] (!%p214_p2)  ;;  %v448_v0 = vand.u32 (!%p214_p2), 127, %v447_v63 }
   0x8   : > { %1460 = vmatpush3.bf16.msra.mxu0 (!%p214_p2), %v1459_v3  ;;  %v1465_v10 = vpack.c.bf16 (!%p214_p2), %v507_v9, %v506_v7  ;;  %v1468_v14 = vpack.c.bf16 (!%p214_p2), %v509_v12, %v508_v11  ;;  %v510_v15 = vld [vmem:[%s2140_s3 + $0x30] sm:$0xff] (!%p214_p2)  ;;  %v511_v16 = vld [vmem:[%s2140_s3 + $0x38] sm:$0xff] (!%p214_p2)  ;;  %v512_v19 = vld [vmem:[%s2140_s3 + $0x40] sm:$0xff] (!%p214_p2) }
   0x9   : > { %1463 = vmatpush3.bf16.msra.mxu1 (!%p214_p2), %v1462_v8  ;;  %1485 = vmatprep.subr.bf16.mxu0 (!%p214_p2), %v1568_v2  ;;  %v1471_v18 = vpack.c.bf16 (!%p214_p2), %v511_v16, %v510_v15  ;;  %v513_v20 = vld [vmem:[%s2140_s3 + $0x48] sm:$0xff] (!%p214_p2)  ;;  %v514_v23 = vld [vmem:[%s2140_s3 + $0x50] sm:$0xff] (!%p214_p2)  ;;  %v515_v24 = vld [vmem:[%s2140_s3 + $0x58] sm:$0xff] (!%p214_p2)  ;;  %vm449_vm2 = vcmp.ge.s32.totalorder (!%p214_p2), %v448_v0, 16  ;;  %vm450_vm3 = vcmp.lt.s32.totalorder (!%p214_p2), %v448_v0, 48 }
   0xa   : > { %1464 = vmatprep.subr.bf16.mxu1 (!%p214_p2), %v1568_v2  ;;  %v1474_v22 = vpack.c.bf16 (!%p214_p2), %v513_v20, %v512_v19  ;;  %v1477_v26 = vpack.c.bf16 (!%p214_p2), %v515_v24, %v514_v23  ;;  %v516_v36 = vld [vmem:[%s2140_s3 + $0x60] sm:$0xff] (!%p214_p2)  ;;  %v517_v37 = vld [vmem:[%s2140_s3 + $0x68] sm:$0xff] (!%p214_p2)  ;;  %v518_v39 = vld [vmem:[%s2140_s3 + $0x70] sm:$0xff] (!%p214_p2) }
   0xb   : > { %v1480_v38 = vpack.c.bf16 (!%p214_p2), %v517_v37, %v516_v36  ;;  %v519_v40 = vld [vmem:[%s2140_s3 + $0x78] sm:$0xff] (!%p214_p2)  ;;  %v702_v42 = vld [vmem:[%s2141_s4] sm:$0xff] (!%p214_p2)  ;;  %v703_v43 = vld [vmem:[%s2141_s4 + $0x8] sm:$0xff] (!%p214_p2) }
   0xc   : > { %v1483_v41 = vpack.c.bf16 (!%p214_p2), %v519_v40, %v518_v39  ;;  %v704_v44 = vld [vmem:[%s2141_s4 + $0x10] sm:$0xff] (!%p214_p2)  ;;  %v1486_v45 = vpack.c.bf16 (!%p214_p2), %v703_v43, %v702_v42  ;;  %v705_v46 = vld [vmem:[%s2141_s4 + $0x18] sm:$0xff] (!%p214_p2)  ;;  %v706_v48 = vld [vmem:[%s2141_s4 + $0x20] sm:$0xff] (!%p214_p2) }
   0xd   : > { %s2147_s27 = smov (!%p244_p3, %s243_s27), 25  ;;  %1466 = vmatpush3.bf16.msra.mxu1 %v1465_v10  ;;  %v1489_v47 = vpack.c.bf16 %v705_v46, %v704_v44  ;;  %v707_v49 = vld [vmem:[%s2141_s4 + $0x28] sm:$0xff]  ;;  %v708_v51 = vld [vmem:[%s2141_s4 + $0x30] sm:$0xff]  ;;  %v709_v52 = vld [vmem:[%s2141_s4 + $0x38] sm:$0xff] }
   0xe   : > { %s1082_s16 = sshll.u32 %s2147_s27, 3  ;;  %1467 = vmatprep.subr.bf16.mxu1 %v1568_v2  ;;  %v1492_v50 = vpack.c.bf16 %v707_v49, %v706_v48  ;;  %v1495_v53 = vpack.c.bf16 %v709_v52, %v708_v51  ;;  %v710_v54 = vld [vmem:[%s2141_s4 + $0x40] sm:$0xff]  ;;  %v711_v55 = vld [vmem:[%s2141_s4 + $0x48] sm:$0xff]  ;;  %v712_v57 = vld [vmem:[%s2141_s4 + $0x50] sm:$0xff] }
   0xf   : > { %s1654_s19 = scalar_lea.vmem %s2137_s0, %s1082_s16  ;;  %v1498_v56 = vpack.c.bf16 %v711_v55, %v710_v54  ;;  %v713_v58 = vld [vmem:[%s2141_s4 + $0x58] sm:$0xff]  ;;  %v714_v60 = vld [vmem:[%s2141_s4 + $0x60] sm:$0xff]  ;;  %v715_v61 = vld [vmem:[%s2141_s4 + $0x68] sm:$0xff]  ;;  %s2106_s25 = scalar_lea.vmem %s2143_s6, %s1082_s16 }
  0x10   : > { %v255_v13 = vld [vmem:[%s1654_s19] sm:$0xff]  ;;  %v256_v17 = vld [vmem:[%s1654_s19 + $0x8] sm:$0xff]  ;;  %v257_v21 = vld [vmem:[%s1654_s19 + $0x10] sm:$0xff]  ;;  %v1501_v59 = vpack.c.bf16 %v713_v58, %v712_v57  ;;  %v1504_v62 = vpack.c.bf16 %v715_v61, %v714_v60 }
  0x11   : > { %1207 = vmatmul.mubr.msk.f32.vlgmr.msra.gmra.mrb[0].mxu0 %vm277_vm1, %v255_v13  ;;  %1469 = vmatpush3.bf16.msra.mxu1 %v1468_v14  ;;  %v258_v25 = vld [vmem:[%s1654_s19 + $0x18] sm:$0xff]  ;;  %v259_v27 = vld [vmem:[%s1654_s19 + $0x20] sm:$0xff]  ;;  %v260_v28 = vld [vmem:[%s1654_s19 + $0x28] sm:$0xff] }
  0x12   : > { %1209 = vmatprep.mubr.msk.f32.mxu0 %vm1569_vm0, %v1570_v4  ;;  %1470 = vmatprep.subr.bf16.mxu1 %v1568_v2  ;;  %v261_v29 = vld [vmem:[%s1654_s19 + $0x30] sm:$0xff]  ;;  %v262_v30 = vld [vmem:[%s1654_s19 + $0x38] sm:$0xff]  ;;  %v263_v31 = vld [vmem:[%s1654_s19 + $0x40] sm:$0xff] }
  0x13   : > { %v264_v32 = vld [vmem:[%s1654_s19 + $0x48] sm:$0xff]  ;;  %v265_v33 = vld [vmem:[%s1654_s19 + $0x50] sm:$0xff]  ;;  %v266_v34 = vld [vmem:[%s1654_s19 + $0x58] sm:$0xff]  ;;  %1487 = vmatpush3.bf16.msra.mxu0 %v1486_v45 }
  0x14   : > { %v267_v35 = vld [vmem:[%s1654_s19 + $0x60] sm:$0xff]  ;;  %1488 = vmatprep.subr.bf16.mxu0 %v1568_v2  ;;  %vm1800_vm4 = vmand %vm449_vm2, %vm450_vm3 }
  0x15   : > { %1210 = vmatmul.mubr.msk.f32.gmra.mrb[2].mxu0 %vm277_vm1, %v256_v17  ;;  %1472 = vmatpush3.bf16.msra.mxu1 %v1471_v18  ;;  %v1797_v1 = vld [vmem:[%s2139_s2] ss:$0 sm:$0xff] }
  0x16   : > { %1212 = vmatprep.mubr.msk.f32.mxu0 %vm1569_vm0, %v1570_v4  ;;  %1473 = vmatprep.subr.bf16.mxu1 %v1568_v2  ;;  %v861_v7 = vld [vmem:[%s2142_s5] sm:$0xff] }
  0x17   : > { %1490 = vmatpush3.bf16.msra.mxu0 %v1489_v47 }
  0x18   : > { %1491 = vmatprep.subr.bf16.mxu0 %v1568_v2 }
  0x19   : > { %1213 = vmatmul.mubr.msk.f32.gmra.mrb[4].mxu0 %vm277_vm1, %v257_v21  ;;  %1475 = vmatpush3.bf16.msra.mxu1 %v1474_v22 }
  0x1a   : > { %1215 = vmatprep.mubr.msk.f32.mxu0 %vm1569_vm0, %v1570_v4  ;;  %1476 = vmatprep.subr.bf16.mxu1 %v1568_v2 }
  0x1b   : > { %1493 = vmatpush3.bf16.msra.mxu0 %v1492_v50 }
  0x1c   : > { %1494 = vmatprep.subr.bf16.mxu0 %v1568_v2 }
  0x1d   : > { %1216 = vmatmul.mubr.msk.f32.gmra.mrb[6].mxu0 %vm277_vm1, %v258_v25  ;;  %1478 = vmatpush3.bf16.msra.mxu1 %v1477_v26 }
  0x1e   : > { %1218 = vmatprep.mubr.msk.f32.mxu0 %vm1569_vm0, %v1570_v4  ;;  %1479 = vmatprep.subr.bf16.mxu1 %v1568_v2 }
  0x1f   : > { %1496 = vmatpush3.bf16.msra.mxu0 %v1495_v53 }
  0x20   : > { %1497 = vmatprep.subr.bf16.mxu0 %v1568_v2 }
  0x21   : > { %1219 = vmatmul.mubr.msk.f32.gmra.mrb[8].mxu0 %vm277_vm1, %v259_v27  ;;  %1481 = vmatpush3.bf16.msra.mxu1 %v1480_v38 }
  0x22   : > { %1221 = vmatprep.mubr.msk.f32.mxu0 %vm1569_vm0, %v1570_v4  ;;  %1482 = vmatprep.subr.bf16.mxu1 %v1568_v2 }
  0x23   : > { %1499 = vmatpush3.bf16.msra.mxu0 %v1498_v56 }
  0x24   : > { %1500 = vmatprep.subr.bf16.mxu0 %v1568_v2 }
  0x25   : > { %1222 = vmatmul.mubr.msk.f32.gmra.mrb[10].mxu0 %vm277_vm1, %v260_v28  ;;  %1484 = vmatpush3.bf16.msra.mxu1 %v1483_v41 }
  0x26   : > { %1224 = vmatprep.mubr.msk.f32.mxu0 %vm1569_vm0, %v1570_v4  ;;  %1533 = vmatprep.subr.bf16.mxu1 %v1568_v2 }
  0x27   : > { %1502 = vmatpush3.bf16.msra.mxu0 %v1501_v59 }
  0x28   : > { %1503 = vmatprep.subr.bf16.mxu0 %v1568_v2 }
  0x29   : > { %1225 = vmatmul.mubr.msk.f32.gmra.mrb[12].mxu0 %vm277_vm1, %v261_v29 }
  0x2a   : > { %1227 = vmatprep.mubr.msk.f32.mxu0 %vm1569_vm0, %v1570_v4 }
  0x2b   : > { %1505 = vmatpush3.bf16.msra.mxu0 %v1504_v62 }
  0x2c   : > { %1506 = vmatprep.subr.bf16.mxu0 %v1568_v2 }
  0x2d   : > { %1228 = vmatmul.mubr.msk.f32.gmra.mrb[14].mxu0 %vm277_vm1, %v262_v30 }
  0x2e   : > { %1230 = vmatprep.mubr.msk.f32.mxu0 %vm1569_vm0, %v1570_v4 }
  0x31   : > { %1231 = vmatmul.mubr.msk.f32.gmra.mrb[16].mxu0 %vm277_vm1, %v263_v31 }
  0x32   : > { %1233 = vmatprep.mubr.msk.f32.mxu0 %vm1569_vm0, %v1570_v4 }
  0x35   : > { %1234 = vmatmul.mubr.msk.f32.gmra.mrb[18].mxu0 %vm277_vm1, %v264_v32 }
  0x36   : > { %1236 = vmatprep.mubr.msk.f32.mxu0 %vm1569_vm0, %v1570_v4 }
  0x39   : > { %1237 = vmatmul.mubr.msk.f32.gmra.mrb[20].mxu0 %vm277_vm1, %v265_v33 }
  0x3a   : > { %1239 = vmatprep.mubr.msk.f32.mxu0 %vm1569_vm0, %v1570_v4 }
  0x3d   : > { %1240 = vmatmul.mubr.msk.f32.gmra.mrb[22].mxu0 %vm277_vm1, %v266_v34 }
  0x3e   : > { %1242 = vmatprep.mubr.msk.f32.mxu0 %vm1569_vm0, %v1570_v4 }
  0x41   : > { %1243 = vmatmul.mubr.msk.f32.gmra.mrb[24].mxu0 %vm277_vm1, %v267_v35 }
  0x42   : > { %1348 = vmatprep.mubr.msk.f32.mxu0 %vm1569_vm0, %v1570_v4 }
  0xe4   : > { %v383_v3 = vpop.f32.mrb[0].mxu0 }
  0xe5   : > { %v384_v5 = vadd.f32 %v1797_v1, %v383_v3  ;;  %v1208_v6 = vpop.f32.mrb[1].mxu0 }
  0xe7   : > { %vm452_vm5 = vcmp.ge.f32.partialorder %v384_v5, 0.0  ;;  %v465_v8 = vmul.f32 0.01, %v384_v5 }
  0xe8   : > { %v388_v9 = vpop.f32.mrb[2].mxu0 }
  0xe9   : > { %v389_v10 = vadd.f32 %v1797_v1, %v388_v9  ;;  %v1211_v11 = vpop.f32.mrb[3].mxu0  ;;  %v478_v12 = vsel %vm452_vm5, %v384_v5, %v465_v8 }
  0xea   : > { %v1807_v13 = vsel %vm1800_vm4, %v478_v12, %v384_v5 }
  0xeb   : > { %1278 = vmatmul.mubr.f32.vlgmr.msra.gmra.mrb[0].mxu1 %v1807_v13  ;;  %vm453_vm6 = vcmp.ge.f32.partialorder %v389_v10, 0.0  ;;  %v466_v14 = vmul.f32 0.01, %v389_v10 }
  0xec   : > { %v393_v15 = vpop.f32.mrb[4].mxu0  ;;  %1280 = vmatprep.mubr.msk.f32.mxu1 %vm1569_vm0, %v1570_v4 }
  0xed   : > { %v394_v16 = vadd.f32 %v1797_v1, %v393_v15  ;;  %v1214_v17 = vpop.f32.mrb[5].mxu0  ;;  %v479_v18 = vsel %vm453_vm6, %v389_v10, %v466_v14 }
  0xee   : > { %v1815_v19 = vsel %vm1800_vm4, %v479_v18, %v389_v10 }
  0xef   : > { %1281 = vmatmul.mubr.f32.gmra.mrb[2].mxu1 %v1815_v19  ;;  %vm454_vm7 = vcmp.ge.f32.partialorder %v394_v16, 0.0  ;;  %v467_v20 = vmul.f32 0.01, %v394_v16 }
  0xf0   : > { %v398_v21 = vpop.f32.mrb[6].mxu0  ;;  %1283 = vmatprep.mubr.msk.f32.mxu1 %vm1569_vm0, %v1570_v4 }
  0xf1   : > { %v399_v22 = vadd.f32 %v1797_v1, %v398_v21  ;;  %v1217_v23 = vpop.f32.mrb[7].mxu0  ;;  %v480_v24 = vsel %vm454_vm7, %v394_v16, %v467_v20 }
  0xf2   : > { %v1823_v25 = vsel %vm1800_vm4, %v480_v24, %v394_v16 }
  0xf3   : > { %1284 = vmatmul.mubr.f32.gmra.mrb[4].mxu1 %v1823_v25  ;;  %vm455_vm8 = vcmp.ge.f32.partialorder %v399_v22, 0.0  ;;  %v468_v26 = vmul.f32 0.01, %v399_v22 }
  0xf4   : > { %v403_v27 = vpop.f32.mrb[8].mxu0  ;;  %1286 = vmatprep.mubr.msk.f32.mxu1 %vm1569_vm0, %v1570_v4 }
  0xf5   : > { %v404_v28 = vadd.f32 %v1797_v1, %v403_v27  ;;  %v1220_v29 = vpop.f32.mrb[9].mxu0  ;;  %v481_v30 = vsel %vm455_vm8, %v399_v22, %v468_v26  ;;  %v717_v26 = vld [vmem:[%s2141_s4 + $0x78] sm:$0xff] }
  0xf6   : > { %v1831_v31 = vsel %vm1800_vm4, %v481_v30, %v399_v22  ;;  %v863_v30 = vld [vmem:[%s2142_s5 + $0x10] sm:$0xff] }
  0xf7   : > { %1287 = vmatmul.mubr.f32.gmra.mrb[6].mxu1 %v1831_v31  ;;  %vm456_vm9 = vcmp.ge.f32.partialorder %v404_v28, 0.0  ;;  %v469_v32 = vmul.f32 0.01, %v404_v28 }
  0xf8   : > { %v408_v33 = vpop.f32.mrb[10].mxu0  ;;  %1289 = vmatprep.mubr.msk.f32.mxu1 %vm1569_vm0, %v1570_v4 }
  0xf9   : > { %v409_v34 = vadd.f32 %v1797_v1, %v408_v33  ;;  %v1223_v35 = vpop.f32.mrb[11].mxu0  ;;  %v482_v36 = vsel %vm456_vm9, %v404_v28, %v469_v32  ;;  %v864_v32 = vld [vmem:[%s2142_s5 + $0x18] sm:$0xff] }
  0xfa   : > { %v1839_v37 = vsel %vm1800_vm4, %v482_v36, %v404_v28  ;;  %v862_v28 = vld [vmem:[%s2142_s5 + $0x8] sm:$0xff]  ;;  %v1513_v33 = vpack.c.bf16 %v864_v32, %v863_v30 }
  0xfb   : > { %1290 = vmatmul.mubr.f32.gmra.mrb[8].mxu1 %v1839_v37  ;;  %vm457_vm10 = vcmp.ge.f32.partialorder %v409_v34, 0.0  ;;  %v470_v38 = vmul.f32 0.01, %v409_v34  ;;  %v1510_v29 = vpack.c.bf16 %v862_v28, %v861_v7  ;;  %v866_v35 = vld [vmem:[%s2142_s5 + $0x28] sm:$0xff] }
  0xfc   : > { %v413_v39 = vpop.f32.mrb[12].mxu0  ;;  %1292 = vmatprep.mubr.msk.f32.mxu1 %vm1569_vm0, %v1570_v4 }
  0xfd   : > { %v414_v40 = vadd.f32 %v1797_v1, %v413_v39  ;;  %v1226_v41 = vpop.f32.mrb[13].mxu0  ;;  %v483_v42 = vsel %vm457_vm10, %v409_v34, %v470_v38  ;;  %1541 = vmatpush3.bf16.msra.mxu1 %v1510_v29  ;;  %v867_v38 = vld [vmem:[%s2142_s5 + $0x30] sm:$0xff]  ;;  %v868_v39 = vld [vmem:[%s2142_s5 + $0x38] sm:$0xff] }
  0xfe   : > { %v1847_v43 = vsel %vm1800_vm4, %v483_v42, %v409_v34  ;;  %1534 = vmatprep.subr.bf16.mxu1 %v1568_v2  ;;  %v865_v34 = vld [vmem:[%s2142_s5 + $0x20] sm:$0xff]  ;;  %v870_v42 = vld [vmem:[%s2142_s5 + $0x48] sm:$0xff] }
  0xff   : > { %1293 = vmatmul.mubr.f32.gmra.mrb[10].mxu1 %v1847_v43  ;;  %vm458_vm11 = vcmp.ge.f32.partialorder %v414_v40, 0.0  ;;  %v471_v44 = vmul.f32 0.01, %v414_v40  ;;  %v1516_v36 = vpack.c.bf16 %v866_v35, %v865_v34  ;;  %v869_v41 = vld [vmem:[%s2142_s5 + $0x40] sm:$0xff] }
 0x100   : > { %v418_v45 = vpop.f32.mrb[14].mxu0  ;;  %1295 = vmatprep.mubr.msk.f32.mxu1 %vm1569_vm0, %v1570_v4 }
 0x101   : > { %v419_v46 = vadd.f32 %v1797_v1, %v418_v45  ;;  %v1229_v47 = vpop.f32.mrb[15].mxu0  ;;  %v484_v48 = vsel %vm458_vm11, %v414_v40, %v471_v44  ;;  %1542 = vmatpush3.bf16.msra.mxu1 %v1513_v33  ;;  %v1948_v44 = vpack.c.bf16 %v870_v42, %v869_v41  ;;  %v871_v45 = vld [vmem:[%s2142_s5 + $0x50] sm:$0xff] }
 0x102   : > { %v1855_v49 = vsel %vm1800_vm4, %v484_v48, %v414_v40  ;;  %1535 = vmatprep.subr.bf16.mxu1 %v1568_v2  ;;  %v1519_v40 = vpack.c.bf16 %v868_v39, %v867_v38  ;;  %v873_v48 = vld [vmem:[%s2142_s5 + $0x60] sm:$0xff] }
 0x103   : > { %1296 = vmatmul.mubr.f32.gmra.mrb[12].mxu1 %v1855_v49  ;;  %vm459_vm12 = vcmp.ge.f32.partialorder %v419_v46, 0.0  ;;  %v472_v50 = vmul.f32 0.01, %v419_v46 }
 0x104   : > { %v423_v51 = vpop.f32.mrb[16].mxu0  ;;  %1298 = vmatprep.mubr.msk.f32.mxu1 %vm1569_vm0, %v1570_v4 }
 0x105   : > { %v424_v52 = vadd.f32 %v1797_v1, %v423_v51  ;;  %v1232_v53 = vpop.f32.mrb[17].mxu0  ;;  %v485_v54 = vsel %vm459_vm12, %v419_v46, %v472_v50  ;;  %1543 = vmatpush3.bf16.msra.mxu1 %v1516_v36  ;;  %v874_v50 = vld [vmem:[%s2142_s5 + $0x68] sm:$0xff] }
 0x106   : > { %v1863_v55 = vsel %vm1800_vm4, %v485_v54, %v419_v46  ;;  %1536 = vmatprep.subr.bf16.mxu1 %v1568_v2  ;;  %v872_v46 = vld [vmem:[%s2142_s5 + $0x58] sm:$0xff]  ;;  %v1968_v51 = vpack.c.bf16 %v874_v50, %v873_v48 }
 0x107   : > { %1299 = vmatmul.mubr.f32.gmra.mrb[14].mxu1 %v1863_v55  ;;  %vm460_vm13 = vcmp.ge.f32.partialorder %v424_v52, 0.0  ;;  %v473_v56 = vmul.f32 0.01, %v424_v52  ;;  %v1958_v47 = vpack.c.bf16 %v872_v46, %v871_v45 }
 0x108   : > { %v428_v57 = vpop.f32.mrb[18].mxu0  ;;  %1301 = vmatprep.mubr.msk.f32.mxu1 %vm1569_vm0, %v1570_v4 }
 0x109   : > { %v429_v58 = vadd.f32 %v1797_v1, %v428_v57  ;;  %v1235_v59 = vpop.f32.mrb[19].mxu0  ;;  %v486_v60 = vsel %vm460_vm13, %v424_v52, %v473_v56  ;;  %1544 = vmatpush3.bf16.msra.mxu1 %v1519_v40 }
 0x10a   : > { %v1871_v61 = vsel %vm1800_vm4, %v486_v60, %v424_v52  ;;  %1537 = vmatprep.subr.bf16.mxu1 %v1568_v2 }
 0x10b   : > { %1302 = vmatmul.mubr.f32.gmra.mrb[16].mxu1 %v1871_v61  ;;  %vm461_vm14 = vcmp.ge.f32.partialorder %v429_v58, 0.0  ;;  %v474_v62 = vmul.f32 0.01, %v429_v58 }
 0x10c   : > { %v433_v63 = vpop.f32.mrb[20].mxu0  ;;  %1304 = vmatprep.mubr.msk.f32.mxu1 %vm1569_vm0, %v1570_v4 }
 0x10d   : > { %v434_v0 = vadd.f32 %v1797_v1, %v433_v63  ;;  %v1238_v3 = vpop.f32.mrb[21].mxu0  ;;  %v487_v5 = vsel %vm461_vm14, %v429_v58, %v474_v62  ;;  %1545 = vmatpush3.bf16.msra.mxu1 %v1948_v44 }
 0x10e   : > { %v1879_v6 = vsel %vm1800_vm4, %v487_v5, %v429_v58  ;;  %1538 = vmatprep.subr.bf16.mxu1 %v1568_v2 }
 0x10f   : > { %1305 = vmatmul.mubr.f32.gmra.mrb[18].mxu1 %v1879_v6  ;;  %vm462_vm15 = vcmp.ge.f32.partialorder %v434_v0, 0.0  ;;  %v475_v8 = vmul.f32 0.01, %v434_v0 }
 0x110   : > { %v438_v9 = vpop.f32.mrb[22].mxu0  ;;  %1307 = vmatprep.mubr.msk.f32.mxu1 %vm1569_vm0, %v1570_v4 }
 0x111   : > { %v439_v10 = vadd.f32 %v1797_v1, %v438_v9  ;;  %v1241_v11 = vpop.f32.mrb[23].mxu0  ;;  %v488_v12 = vsel %vm462_vm15, %v434_v0, %v475_v8  ;;  %1546 = vmatpush3.bf16.msra.mxu1 %v1958_v47 }
 0x112   : > { %v1887_v14 = vsel %vm1800_vm4, %v488_v12, %v434_v0  ;;  %1539 = vmatprep.subr.bf16.mxu1 %v1568_v2 }
 0x113   : > { %1308 = vmatmul.mubr.f32.gmra.mrb[20].mxu1 %v1887_v14  ;;  %vm463_vm1 = vcmp.ge.f32.partialorder %v439_v10, 0.0  ;;  %v476_v15 = vmul.f32 0.01, %v439_v10 }
 0x114   : > { %v443_v16 = vpop.f32.mrb[24].mxu0  ;;  %1310 = vmatprep.mubr.msk.f32.mxu1 %vm1569_vm0, %v1570_v4 }
 0x115   : > { %v444_v17 = vadd.f32 %v1797_v1, %v443_v16  ;;  %v1244_v18 = vpop.f32.mrb[25].mxu0  ;;  %v489_v20 = vsel %vm463_vm1, %v439_v10, %v476_v15  ;;  %v716_v1 = vld [vmem:[%s2141_s4 + $0x70] sm:$0xff]  ;;  %1547 = vmatpush3.bf16.msra.mxu1 %v1968_v51  ;;  %vm1007_vm1 = vcmask 64512  }
 0x116   : > { %v1895_v21 = vsel %vm1800_vm4, %v489_v20, %v439_v10  ;;  %v1507_v27 = vpack.c.bf16 %v717_v26, %v716_v1  ;;  %1540 = vmatprep.subr.bf16.mxu1 %v1568_v2 }
 0x117   : > { %1311 = vmatmul.mubr.f32.gmra.mrb[22].mxu1 %v1895_v21  ;;  %vm464_vm2 = vcmp.ge.f32.partialorder %v444_v17, 0.0  ;;  %v477_v22 = vmul.f32 0.01, %v444_v17 }
 0x118   : > { %1313 = vmatprep.mubr.msk.f32.mxu1 %vm1569_vm0, %v1570_v4  ;;  %1508 = vmatpush3.bf16.msra.mxu0 %v1507_v27 }
 0x119   : > { %v490_v23 = vsel %vm464_vm2, %v444_v17, %v477_v22  ;;  %1509 = vmatprep.subr.bf16.mxu0 %v1568_v2 }
 0x11a   : > { %v1902_v24 = vsel %vm1800_vm4, %v490_v23, %v444_v17 }
 0x11b   : > { %1314 = vmatmul.mubr.f32.gmra.mrb[24].mxu1 %v1902_v24 }
 0x11c   : > { %1428 = vmatprep.mubr.msk.f32.mxu1 %vm1569_vm0, %v1570_v4 }
 0x1be   : > { %v586_v52 = vpop.f32.mrb[0].mxu1 }
 0x1bf   : > { %vm650_vm3 = vcmp.ge.f32.partialorder %v586_v52, 0.0  ;;  %v663_v53 = vmul.f32 0.01, %v586_v52  ;;  %v1279_v54 = vpop.f32.mrb[1].mxu1 }
 0x1c1   : > { %v676_v56 = vsel %vm650_vm3, %v586_v52, %v663_v53 }
 0x1c2   : > { %v1973_v57 = vadd.f32 %v676_v56, %v1807_v13  ;;  %v591_v58 = vpop.f32.mrb[2].mxu1 }
 0x1c3   : > { %vm651_vm4 = vcmp.ge.f32.partialorder %v591_v58, 0.0  ;;  %v664_v59 = vmul.f32 0.01, %v591_v58  ;;  %v1282_v60 = vpop.f32.mrb[3].mxu1 }
 0x1c4   : > { %1349 = vmatmul.mubr.f32.vlgmr.msra.gmra.mrb[26].mxu0 %v1973_v57 }
 0x1c5   : > { %v677_v62 = vsel %vm651_vm4, %v591_v58, %v664_v59  ;;  %1351 = vmatprep.mubr.msk.f32.mxu0 %vm1569_vm0, %v1570_v4  ;;  %1511 = vmatpush3.bf16.msra.mxu0 %v1510_v29  ;;  %v876_v58 = vld [vmem:[%s2142_s5 + $0x78] sm:$0xff] }
 0x1c6   : > { %v596_v63 = vpop.f32.mrb[4].mxu1  ;;  %v1979_v0 = vadd.f32 %v677_v62, %v1815_v19  ;;  %1512 = vmatprep.subr.bf16.mxu0 %v1568_v2 }
 0x1c7   : > { %vm652_vm5 = vcmp.ge.f32.partialorder %v596_v63, 0.0  ;;  %v665_v13 = vmul.f32 0.01, %v596_v63  ;;  %v1285_v3 = vpop.f32.mrb[5].mxu1 }
 0x1c8   : > { %1352 = vmatmul.mubr.f32.gmra.mrb[28].mxu0 %v1979_v0 }
 0x1c9   : > { %v678_v5 = vsel %vm652_vm5, %v596_v63, %v665_v13  ;;  %1354 = vmatprep.mubr.msk.f32.mxu0 %vm1569_vm0, %v1570_v4  ;;  %1514 = vmatpush3.bf16.msra.mxu0 %v1513_v33 }
 0x1ca   : > { %v601_v8 = vpop.f32.mrb[6].mxu1  ;;  %v1986_v9 = vadd.f32 %v678_v5, %v1823_v25  ;;  %1515 = vmatprep.subr.bf16.mxu0 %v1568_v2 }
 0x1cb   : > { %vm653_vm6 = vcmp.ge.f32.partialorder %v601_v8, 0.0  ;;  %v666_v19 = vmul.f32 0.01, %v601_v8  ;;  %v1288_v10 = vpop.f32.mrb[7].mxu1 }
 0x1cc   : > { %1355 = vmatmul.mubr.f32.gmra.mrb[30].mxu0 %v1986_v9 }
 0x1cd   : > { %v679_v11 = vsel %vm653_vm6, %v601_v8, %v666_v19  ;;  %1357 = vmatprep.mubr.msk.f32.mxu0 %vm1569_vm0, %v1570_v4  ;;  %1517 = vmatpush3.bf16.msra.mxu0 %v1516_v36 }
 0x1ce   : > { %v606_v12 = vpop.f32.mrb[8].mxu1  ;;  %v1993_v15 = vadd.f32 %v679_v11, %v1831_v31  ;;  %1518 = vmatprep.subr.bf16.mxu0 %v1568_v2 }
 0x1cf   : > { %vm654_vm7 = vcmp.ge.f32.partialorder %v606_v12, 0.0  ;;  %v667_v25 = vmul.f32 0.01, %v606_v12  ;;  %v1291_v16 = vpop.f32.mrb[9].mxu1 }
 0x1d0   : > { %1358 = vmatmul.mubr.f32.gmra.mrb[32].mxu0 %v1993_v15 }
 0x1d1   : > { %v680_v17 = vsel %vm654_vm7, %v606_v12, %v667_v25  ;;  %1360 = vmatprep.mubr.msk.f32.mxu0 %vm1569_vm0, %v1570_v4  ;;  %1520 = vmatpush3.bf16.msra.mxu0 %v1519_v40 }
 0x1d2   : > { %v611_v18 = vpop.f32.mrb[10].mxu1  ;;  %v2000_v20 = vadd.f32 %v680_v17, %v1839_v37  ;;  %1521 = vmatprep.subr.bf16.mxu0 %v1568_v2 }
 0x1d3   : > { %vm655_vm8 = vcmp.ge.f32.partialorder %v611_v18, 0.0  ;;  %v668_v31 = vmul.f32 0.01, %v611_v18  ;;  %v1294_v22 = vpop.f32.mrb[11].mxu1 }
 0x1d4   : > { %1361 = vmatmul.mubr.f32.gmra.mrb[34].mxu0 %v2000_v20 }
 0x1d5   : > { %v681_v23 = vsel %vm655_vm8, %v611_v18, %v668_v31  ;;  %1363 = vmatprep.mubr.msk.f32.mxu0 %vm1569_vm0, %v1570_v4  ;;  %1523 = vmatpush3.bf16.msra.mxu0 %v1948_v44 }
 0x1d6   : > { %v616_v1 = vpop.f32.mrb[12].mxu1  ;;  %v2008_v26 = vadd.f32 %v681_v23, %v1847_v43  ;;  %1524 = vmatprep.subr.bf16.mxu0 %v1568_v2 }
 0x1d7   : > { %vm656_vm9 = vcmp.ge.f32.partialorder %v616_v1, 0.0  ;;  %v669_v37 = vmul.f32 0.01, %v616_v1  ;;  %v1297_v27 = vpop.f32.mrb[13].mxu1 }
 0x1d8   : > { %1364 = vmatmul.mubr.f32.gmra.mrb[36].mxu0 %v2008_v26 }
 0x1d9   : > { %v682_v7 = vsel %vm656_vm9, %v616_v1, %v669_v37  ;;  %1366 = vmatprep.mubr.msk.f32.mxu0 %vm1569_vm0, %v1570_v4  ;;  %1526 = vmatpush3.bf16.msra.mxu0 %v1958_v47 }
 0x1da   : > { %v621_v28 = vpop.f32.mrb[14].mxu1  ;;  %v2016_v29 = vadd.f32 %v682_v7, %v1855_v49  ;;  %1527 = vmatprep.subr.bf16.mxu0 %v1568_v2 }
 0x1db   : > { %vm657_vm10 = vcmp.ge.f32.partialorder %v621_v28, 0.0  ;;  %v670_v43 = vmul.f32 0.01, %v621_v28  ;;  %v1300_v30 = vpop.f32.mrb[15].mxu1 }
 0x1dc   : > { %1367 = vmatmul.mubr.f32.gmra.mrb[38].mxu0 %v2016_v29 }
 0x1dd   : > { %v683_v32 = vsel %vm657_vm10, %v621_v28, %v670_v43  ;;  %1369 = vmatprep.mubr.msk.f32.mxu0 %vm1569_vm0, %v1570_v4  ;;  %1529 = vmatpush3.bf16.msra.mxu0 %v1968_v51 }
 0x1de   : > { %v626_v33 = vpop.f32.mrb[16].mxu1  ;;  %v2024_v34 = vadd.f32 %v683_v32, %v1863_v55  ;;  %1530 = vmatprep.subr.bf16.mxu0 %v1568_v2 }
 0x1df   : > { %vm658_vm11 = vcmp.ge.f32.partialorder %v626_v33, 0.0  ;;  %v671_v49 = vmul.f32 0.01, %v626_v33  ;;  %v1303_v35 = vpop.f32.mrb[17].mxu1 }
 0x1e0   : > { %1370 = vmatmul.mubr.f32.gmra.mrb[40].mxu0 %v2024_v34 }
 0x1e1   : > { %v684_v36 = vsel %vm658_vm11, %v626_v33, %v671_v49  ;;  %1372 = vmatprep.mubr.msk.f32.mxu0 %vm1569_vm0, %v1570_v4 }
 0x1e2   : > { %v631_v38 = vpop.f32.mrb[18].mxu1  ;;  %v2031_v39 = vadd.f32 %v684_v36, %v1871_v61 }
 0x1e3   : > { %vm659_vm12 = vcmp.ge.f32.partialorder %v631_v38, 0.0  ;;  %v672_v40 = vmul.f32 0.01, %v631_v38  ;;  %v1306_v41 = vpop.f32.mrb[19].mxu1 }
 0x1e4   : > { %1373 = vmatmul.mubr.f32.gmra.mrb[42].mxu0 %v2031_v39 }
 0x1e5   : > { %v685_v55 = vsel %vm659_vm12, %v631_v38, %v672_v40  ;;  %1375 = vmatprep.mubr.msk.f32.mxu0 %vm1569_vm0, %v1570_v4 }
 0x1e6   : > { %v636_v2 = vpop.f32.mrb[20].mxu1  ;;  %v2037_v42 = vadd.f32 %v685_v55, %v1879_v6 }
 0x1e7   : > { %vm660_vm13 = vcmp.ge.f32.partialorder %v636_v2, 0.0  ;;  %v673_v44 = vmul.f32 0.01, %v636_v2  ;;  %v1309_v45 = vpop.f32.mrb[21].mxu1 }
 0x1e8   : > { %1376 = vmatmul.mubr.f32.gmra.mrb[44].mxu0 %v2037_v42 }
 0x1e9   : > { %v686_v61 = vsel %vm660_vm13, %v636_v2, %v673_v44  ;;  %1378 = vmatprep.mubr.msk.f32.mxu0 %vm1569_vm0, %v1570_v4 }
 0x1ea   : > { %v641_v46 = vpop.f32.mrb[22].mxu1  ;;  %v2043_v47 = vadd.f32 %v686_v61, %v1887_v14 }
 0x1eb   : > { %vm661_vm14 = vcmp.ge.f32.partialorder %v641_v46, 0.0  ;;  %v674_v48 = vmul.f32 0.01, %v641_v46  ;;  %v1312_v50 = vpop.f32.mrb[23].mxu1 }
 0x1ec   : > { %1379 = vmatmul.mubr.f32.gmra.mrb[46].mxu0 %v2043_v47 }
 0x1ed   : > { %v687_v6 = vsel %vm661_vm14, %v641_v46, %v674_v48  ;;  %1381 = vmatprep.mubr.msk.f32.mxu0 %vm1569_vm0, %v1570_v4 }
 0x1ee   : > { %v646_v51 = vpop.f32.mrb[24].mxu1  ;;  %v2049_v52 = vadd.f32 %v687_v6, %v1895_v21  ;;  %v875_v21 = vld [vmem:[%s2142_s5 + $0x70] sm:$0xff] }
 0x1ef   : > { %vm662_vm15 = vcmp.ge.f32.partialorder %v646_v51, 0.0  ;;  %v675_v53 = vmul.f32 0.01, %v646_v51  ;;  %v1315_v54 = vpop.f32.mrb[25].mxu1  ;;  %v1531_v59 = vpack.c.bf16 %v876_v58, %v875_v21 }
 0x1f0   : > { %1382 = vmatmul.mubr.f32.gmra.mrb[48].mxu0 %v2049_v52 }
 0x1f1   : > { %v688_v14 = vsel %vm662_vm15, %v646_v51, %v675_v53  ;;  %1384 = vmatprep.mubr.msk.f32.mxu0 %vm1569_vm0, %v1570_v4  ;;  %1532 = vmatpush3.bf16.msra.mxu0 %v1531_v59 }
 0x1f2   : > { %v2055_v56 = vadd.f32 %v688_v14, %v1902_v24  ;;  %1548 = vmatpush3.bf16.msra.mxu1 %v1531_v59 }
 0x1f4   : > { %1385 = vmatmul.mubr.f32.gmra.mrb[50].mxu0 %v2055_v56 }
 0x1f5   : > { %1419 = vmatprep.mubr.msk.f32.mxu0 %vm1569_vm0, %v1570_v4 }
 0x297   : > { %v784_v60 = vpop.f32.mrb[26].mxu0 }
 0x298   : > { %v848_v24 = vadd.f32 %v784_v60, %v1973_v57  ;;  %v1350_v62 = vpop.f32.mrb[27].mxu0 }
 0x29a   : > { %1420 = vmatmul.mubr.f32.vlgmr.msra.gmra.mrb[52].mxu0 %v848_v24 }
 0x29b   : > { %v789_v63 = vpop.f32.mrb[28].mxu0  ;;  %1422 = vmatprep.mubr.msk.f32.mxu0 %vm1569_vm0, %v1570_v4 }
 0x29c   : > { %v849_v13 = vadd.f32 %v789_v63, %v1979_v0  ;;  %v1353_v3 = vpop.f32.mrb[29].mxu0 }
 0x29e   : > { %1423 = vmatmul.mubr.f32.gmra.mrb[54].mxu0 %v849_v13 }
 0x29f   : > { %v794_v5 = vpop.f32.mrb[30].mxu0  ;;  %1425 = vmatprep.mubr.msk.f32.mxu0 %vm1569_vm0, %v1570_v4 }
 0x2a0   : > { %v850_v8 = vadd.f32 %v794_v5, %v1986_v9  ;;  %v1356_v19 = vpop.f32.mrb[31].mxu0 }
 0x2a2   : > { %1426 = vmatmul.mubr.f32.gmra.mrb[56].mxu0 %v850_v8 }
 0x2a3   : > { %v799_v10 = vpop.f32.mrb[32].mxu0 }
 0x2a4   : > { %v851_v57 = vadd.f32 %v799_v10, %v1993_v15  ;;  %v1359_v11 = vpop.f32.mrb[33].mxu0 }
 0x2a6   : > { %1429 = vmatmul.mubr.f32.vlgmr.msra.gmra.mrb[26].mxu1 %v851_v57 }
 0x2a7   : > { %v804_v12 = vpop.f32.mrb[34].mxu0  ;;  %1431 = vmatprep.mubr.msk.f32.mxu1 %vm1569_vm0, %v1570_v4 }
 0x2a8   : > { %v852_v0 = vadd.f32 %v804_v12, %v2000_v20  ;;  %v1362_v25 = vpop.f32.mrb[35].mxu0 }
 0x2aa   : > { %1432 = vmatmul.mubr.f32.gmra.mrb[28].mxu1 %v852_v0 }
 0x2ab   : > { %v809_v16 = vpop.f32.mrb[36].mxu0  ;;  %1434 = vmatprep.mubr.msk.f32.mxu1 %vm1569_vm0, %v1570_v4 }
 0x2ac   : > { %v853_v9 = vadd.f32 %v809_v16, %v2008_v26  ;;  %v1365_v17 = vpop.f32.mrb[37].mxu0 }
 0x2ae   : > { %1435 = vmatmul.mubr.f32.gmra.mrb[30].mxu1 %v853_v9 }
 0x2af   : > { %v814_v18 = vpop.f32.mrb[38].mxu0  ;;  %1437 = vmatprep.mubr.msk.f32.mxu1 %vm1569_vm0, %v1570_v4 }
 0x2b0   : > { %v854_v15 = vadd.f32 %v814_v18, %v2016_v29  ;;  %v1368_v31 = vpop.f32.mrb[39].mxu0 }
 0x2b2   : > { %1438 = vmatmul.mubr.f32.gmra.mrb[32].mxu1 %v854_v15 }
 0x2b3   : > { %v819_v22 = vpop.f32.mrb[40].mxu0  ;;  %1440 = vmatprep.mubr.msk.f32.mxu1 %vm1569_vm0, %v1570_v4 }
 0x2b4   : > { %v855_v20 = vadd.f32 %v819_v22, %v2024_v34  ;;  %v1371_v23 = vpop.f32.mrb[41].mxu0 }
 0x2b6   : > { %1441 = vmatmul.mubr.f32.gmra.mrb[34].mxu1 %v855_v20 }
 0x2b7   : > { %v824_v1 = vpop.f32.mrb[42].mxu0  ;;  %1443 = vmatprep.mubr.msk.f32.mxu1 %vm1569_vm0, %v1570_v4 }
 0x2b8   : > { %v856_v26 = vadd.f32 %v824_v1, %v2031_v39  ;;  %v1374_v37 = vpop.f32.mrb[43].mxu0 }
 0x2ba   : > { %1444 = vmatmul.mubr.f32.gmra.mrb[36].mxu1 %v856_v26 }
 0x2bb   : > { %v829_v27 = vpop.f32.mrb[44].mxu0  ;;  %1446 = vmatprep.mubr.msk.f32.mxu1 %vm1569_vm0, %v1570_v4 }
 0x2bc   : > { %v857_v7 = vadd.f32 %v829_v27, %v2037_v42  ;;  %v1377_v28 = vpop.f32.mrb[45].mxu0 }
 0x2be   : > { %1447 = vmatmul.mubr.f32.gmra.mrb[38].mxu1 %v857_v7 }
 0x2bf   : > { %v834_v29 = vpop.f32.mrb[46].mxu0  ;;  %1449 = vmatprep.mubr.msk.f32.mxu1 %vm1569_vm0, %v1570_v4 }
 0x2c0   : > { %v858_v43 = vadd.f32 %v834_v29, %v2043_v47  ;;  %v1380_v30 = vpop.f32.mrb[47].mxu0 }
 0x2c2   : > { %1450 = vmatmul.mubr.f32.gmra.mrb[40].mxu1 %v858_v43 }
 0x2c3   : > { %v839_v32 = vpop.f32.mrb[48].mxu0  ;;  %1452 = vmatprep.mubr.msk.f32.mxu1 %vm1569_vm0, %v1570_v4 }
 0x2c4   : > { %v859_v33 = vadd.f32 %v839_v32, %v2049_v52  ;;  %v1383_v34 = vpop.f32.mrb[49].mxu0 }
 0x2c6   : > { %1453 = vmatmul.mubr.f32.gmra.mrb[42].mxu1 %v859_v33 }
 0x2c7   : > { %v844_v49 = vpop.f32.mrb[50].mxu0  ;;  %1455 = vmatprep.mubr.msk.f32.mxu1 %vm1569_vm0, %v1570_v4 }
 0x2c8   : > { %v860_v35 = vadd.f32 %v844_v49, %v2055_v56  ;;  %v1386_v36 = vpop.f32.mrb[51].mxu0 }
 0x2ca   : > { %1456 = vmatmul.mubr.f32.gmra.mrb[44].mxu1 %v860_v35 }
 0x36d   : > { %v943_v38 = vpop.f32.mrb[52].mxu0 }
 0x36e   : > { %1008 = vst.msk [vmem:[%s2106_s25] sm:$0xff] %vm1007_vm1, %v943_v38  ;;  %v1421_v4 = vpop.f32.mrb[53].mxu0 }
 0x371   : > { %v948_v39 = vpop.f32.mrb[54].mxu0 }
 0x372   : > { %1009 = vst.msk [vmem:[%s2106_s25 + $0x8] sm:$0xff] %vm1007_vm1, %v948_v39  ;;  %v1424_v40 = vpop.f32.mrb[55].mxu0 }
 0x375   : > { %v953_v41 = vpop.f32.mrb[56].mxu0 }
 0x376   : > { %1010 = vst.msk [vmem:[%s2106_s25 + $0x10] sm:$0xff] %vm1007_vm1, %v953_v41  ;;  %v1427_v55 = vpop.f32.mrb[57].mxu0 }
 0x379   : > { %v958_v2 = vpop.f32.mrb[26].mxu1 }
 0x37a   : > { %1011 = vst.msk [vmem:[%s2106_s25 + $0x18] sm:$0xff] %vm1007_vm1, %v958_v2  ;;  %v1430_v42 = vpop.f32.mrb[27].mxu1 }
 0x37d   : > { %v963_v44 = vpop.f32.mrb[28].mxu1 }
 0x37e   : > { %1012 = vst.msk [vmem:[%s2106_s25 + $0x20] sm:$0xff] %vm1007_vm1, %v963_v44  ;;  %v1433_v45 = vpop.f32.mrb[29].mxu1 }
 0x381   : > { %v968_v61 = vpop.f32.mrb[30].mxu1 }
 0x382   : > { %1013 = vst.msk [vmem:[%s2106_s25 + $0x28] sm:$0xff] %vm1007_vm1, %v968_v61  ;;  %v1436_v46 = vpop.f32.mrb[31].mxu1 }
 0x385   : > { %v973_v47 = vpop.f32.mrb[32].mxu1 }
 0x386   : > { %1014 = vst.msk [vmem:[%s2106_s25 + $0x30] sm:$0xff] %vm1007_vm1, %v973_v47  ;;  %v1439_v48 = vpop.f32.mrb[33].mxu1 }
 0x389   : > { %v978_v50 = vpop.f32.mrb[34].mxu1 }
 0x38a   : > { %1015 = vst.msk [vmem:[%s2106_s25 + $0x38] sm:$0xff] %vm1007_vm1, %v978_v50  ;;  %v1442_v6 = vpop.f32.mrb[35].mxu1 }
 0x38d   : > { %v983_v51 = vpop.f32.mrb[36].mxu1 }
 0x38e   : > { %1016 = vst.msk [vmem:[%s2106_s25 + $0x40] sm:$0xff] %vm1007_vm1, %v983_v51  ;;  %v1445_v52 = vpop.f32.mrb[37].mxu1 }
 0x391   : > { %v988_v53 = vpop.f32.mrb[38].mxu1 }
 0x392   : > { %1017 = vst.msk [vmem:[%s2106_s25 + $0x48] sm:$0xff] %vm1007_vm1, %v988_v53  ;;  %v1448_v54 = vpop.f32.mrb[39].mxu1 }
 0x395   : > { %v993_v14 = vpop.f32.mrb[40].mxu1 }
 0x396   : > { %1018 = vst.msk [vmem:[%s2106_s25 + $0x50] sm:$0xff] %vm1007_vm1, %v993_v14  ;;  %v1451_v56 = vpop.f32.mrb[41].mxu1 }
 0x399   : > { %v998_v21 = vpop.f32.mrb[42].mxu1 }
 0x39a   : > { %1019 = vst.msk [vmem:[%s2106_s25 + $0x58] sm:$0xff] %vm1007_vm1, %v998_v21  ;;  %v1454_v58 = vpop.f32.mrb[43].mxu1 }
 0x39d   : > { %v1003_v59 = vpop.f32.mrb[44].mxu1 }
 0x39e   : > { %1020 = vst.msk [vmem:[%s2106_s25 + $0x60] sm:$0xff] %vm1007_vm1, %v1003_v59  ;;  %v1457_v60 = vpop.f32.mrb[45].mxu1 }
 0x39f PF: > { %s16_s21 = sadd.s32 1, %s1566_s21  }
 0x3a0   : > { %p13_p4 = scmp.ge.s32.totalorder %s16_s21, 4  }
 0x3a2   :  { %15 = sbr.rel (!%p13_p4) target bundleno = 1 (0x1), region = 74 }

</bundles_post_ra>
